<compile_context>
chip_gen: v7x
topology: tpu7x:2x2x1
jax: 0.10.0
libtpu: 0.0.40
codegen_flags: <defaults>
</compile_context>

<pallas_src>
import jax
import jax.numpy as jnp
from jax.experimental import pallas as pl
from jax.experimental.pallas import tpu as pltpu


def _round_up(x, m):
    return ((x + m - 1) // m) * m


def _shap_xgb_forward_kernel(x_ref, sel_ref, thr_ref, delta3_ref, off_ref,
                             out_ref):
    # x_ref:      (TN, F)  f32 feature tile (batch rows along sublanes)
    # sel_ref:    (F, Tp)  bf16 one-hot split-feature selector per tree (0/1)
    # thr_ref:    (1, Tp)  f32 split thresholds
    # delta3_ref: (Tp, 3)  bf16 exact 3-term split of (left - right) per tree
    # off_ref:    (1,)     f32 SMEM scalar: base_score + sum(right)
    # out_ref:    (TN, 1)  f32 predictions for this tile
    x = x_ref[...]

    # Exact bf16x3 split of x (x == hi + mid + lo bit-exactly), so the one-hot
    # MXU gather reproduces x[:, feat_idx] exactly with three single-pass bf16
    # matmuls instead of a 6-pass HIGHEST-precision f32 dot.
    x_hi = x.astype(jnp.bfloat16)
    r1 = x - x_hi.astype(jnp.float32)
    x_md = r1.astype(jnp.bfloat16)
    x_lo = (r1 - x_md.astype(jnp.float32)).astype(jnp.bfloat16)

    sel = sel_ref[...]
    vals = jnp.dot(x_hi, sel, preferred_element_type=jnp.float32)
    vals = vals + jnp.dot(x_md, sel, preferred_element_type=jnp.float32)
    vals = vals + jnp.dot(x_lo, sel, preferred_element_type=jnp.float32)  # (TN, Tp)

    # Depth-1 stump indicator: exact 0/1, so bf16 LHS is lossless.
    ind = (vals < thr_ref[...]).astype(jnp.bfloat16)                      # (TN, Tp)

    # Tree reduction on the MXU in a single pass against the three stacked
    # bf16 delta terms, then a tiny 3-lane sum reconstructs full precision.
    acc3 = jnp.dot(ind, delta3_ref[...],
                   preferred_element_type=jnp.float32)                    # (TN, 3)
    acc = jnp.sum(acc3, axis=-1, keepdims=True)                           # (TN, 1)

    out_ref[...] = acc + off_ref[0]


def _vmem_config():
    # Generation-aware VMEM sizing: conservative on v7x (64 MiB/TC), still
    # plenty on v5e/v6e (128 MiB).
    try:
        cap = pltpu.get_tpu_info().vmem_capacity_bytes
    except Exception:
        cap = 64 * 1024 * 1024
    limit = min(40 * 1024 * 1024, (cap * 5) // 8)
    budget = limit // 2
    return budget, limit


def _pick_tile_rows(n, f, t_pad, vmem_budget_bytes):
    # Per-row VMEM: double-buffered f32 x rows, bf16x3 split copies, the
    # (TN, Tp) f32 scores + bf16 indicator (+ one f32 temp), small acc/out.
    per_row = 4 * 2 * f + 2 * 3 * f + (4 + 2 + 4) * t_pad + 4 * 8
    tn = max(8, vmem_budget_bytes // per_row)
    tn = min(tn, 8192)            # amortizes ~0.35 us/step fixed overhead
    tn = (tn // 8) * 8
    tn = min(tn, _round_up(n, 8))
    # Keep >= 2 grid steps for non-trivial batches so the "parallel" axis can
    # feed both TensorCores on v7x and the pipeline has more than one stage.
    if n > 16 and pl.cdiv(n, tn) < 2:
        tn = max(8, _round_up(pl.cdiv(n, 2), 8))
    return tn


def shap_backprop_layer_forward(x, feat_idx, thresholds, left_vals, right_vals,
                                base_score, *, tile_rows=None):
    """Forward of SHAPBackpropLayer: predictions of the (synthetic) booster.

    Returns preds of shape (N,) float32, matching the shape/dtype semantics of
    `torch.Tensor(xgboost_model.predict(x))`.
    """
    N, F = x.shape
    T = feat_idx.shape[0]
    # 256-wide MXU output tiles on v6e/v7x: only pad beyond 128 when the
    # ensemble actually exceeds one 128-tree tile.
    t_align = 256 if T > 128 else 128
    T_pad = _round_up(max(T, 1), t_align)

    thresholds = thresholds.astype(jnp.float32)
    left_vals = left_vals.astype(jnp.float32)
    right_vals = right_vals.astype(jnp.float32)

    # One-hot selector (exact 0/1 -> lossless in bf16).
    sel = jax.nn.one_hot(feat_idx, F, dtype=jnp.bfloat16).T          # (F, T)
    sel = jnp.pad(sel, ((0, 0), (0, T_pad - T)))                     # (F, Tp)
    thr = jnp.pad(thresholds, (0, T_pad - T)).reshape(1, T_pad)      # (1, Tp)

    # Exact bf16x3 split of delta = left - right (pad trees contribute 0).
    delta = jnp.pad(left_vals - right_vals, (0, T_pad - T))          # (Tp,)
    d_hi = delta.astype(jnp.bfloat16)
    r = delta - d_hi.astype(jnp.float32)
    d_md = r.astype(jnp.bfloat16)
    d_lo = (r - d_md.astype(jnp.float32)).astype(jnp.bfloat16)
    delta3 = jnp.stack([d_hi, d_md, d_lo], axis=1)                   # (Tp, 3)

    # Constant part of the stump sum, folded into the kernel via SMEM.
    offset = (jnp.asarray(base_score, jnp.float32)
              + jnp.sum(right_vals)).reshape(1)                      # (1,)

    vmem_budget, vmem_limit = _vmem_config()
    if tile_rows is None:
        tile_rows = _pick_tile_rows(N, F, T_pad, vmem_budget)
    tile_rows = max(8, min((tile_rows // 8) * 8, _round_up(N, 8)))
    num_tiles = pl.cdiv(N, tile_rows)   # partial last block handled by Pallas

    x_f32 = x.astype(jnp.float32)       # no full-array pad: x read from HBM once
    # NOTE: if the model tolerates bf16 feature precision at the splits, keep
    # x in bf16 end-to-end instead (halves the dominant HBM read and makes the
    # gather a single MXU pass); comparisons can flip within ~1 bf16 ulp.

    flops = 2 * N * T_pad * (3 * F + 3)          # 3 gather passes + 1 reduce
    bytes_accessed = (4 * N * F + 2 * F * T_pad + 4 * T_pad
                      + 2 * 3 * T_pad + 4 * N + 4)

    out = pl.pallas_call(
        _shap_xgb_forward_kernel,
        out_shape=jax.ShapeDtypeStruct((N, 1), jnp.float32),
        grid=(num_tiles,),
        in_specs=[
            pl.BlockSpec((tile_rows, F), lambda i: (i, 0)),
            pl.BlockSpec((F, T_pad), lambda i: (0, 0)),
            pl.BlockSpec((1, T_pad), lambda i: (0, 0)),
            pl.BlockSpec((T_pad, 3), lambda i: (0, 0)),
            pl.BlockSpec(memory_space=pltpu.MemorySpace.SMEM),
        ],
        out_specs=pl.BlockSpec((tile_rows, 1), lambda i: (i, 0)),
        compiler_params=pltpu.CompilerParams(
            dimension_semantics=("parallel",),
            vmem_limit_bytes=vmem_limit,
        ),
        cost_estimate=pl.CostEstimate(
            flops=flops, transcendentals=0, bytes_accessed=bytes_accessed),
    )(x_f32, sel, thr, delta3, offset)

    return out[:, 0]


def _reference_forward(x, feat_idx, thresholds, left_vals, right_vals,
                       base_score):
    vals = x[:, feat_idx]                                           # (N, T)
    leaf = jnp.where(vals < thresholds[None, :], left_vals[None, :],
                     right_vals[None, :])
    return base_score + jnp.sum(leaf, axis=-1)


if __name__ == "__main__":
    key = jax.random.PRNGKey(0)
    k_x, k_f, k_t, k_l, k_r, k_x2 = jax.random.split(key, 6)

    F, T = 16, 32   # n_features, n_trees

    # Deterministic synthetic "xgboost booster" parameters.
    feat_idx = jax.random.randint(k_f, (T,), 0, F, dtype=jnp.int32)
    thresholds = jax.random.normal(k_t, (T,), dtype=jnp.float32) * 0.5
    left_vals = jax.random.normal(k_l, (T,), dtype=jnp.float32) * 0.1
    right_vals = jax.random.normal(k_r, (T,), dtype=jnp.float32) * 0.1
    base_score = jnp.float32(0.5)

    # Small batch: single tile.
    x_small = jax.random.normal(k_x, (8, F), dtype=jnp.float32)
    preds_small = jax.block_until_ready(shap_backprop_layer_forward(
        x_small, feat_idx, thresholds, left_vals, right_vals, base_score))
    ref_small = _reference_forward(
        x_small, feat_idx, thresholds, left_vals, right_vals, base_score)
    assert preds_small.shape == (8,)
    assert jnp.allclose(preds_small, ref_small, atol=1e-5, rtol=1e-5)

    # Ragged batch, auto tile size: exercises the >=2-tile split and the
    # masked partial last block (no wrapper-side padding of x).
    x_big = jax.random.normal(k_x2, (300, F), dtype=jnp.float32)
    preds_auto = jax.block_until_ready(shap_backprop_layer_forward(
        x_big, feat_idx, thresholds, left_vals, right_vals, base_score))
    ref_big = _reference_forward(
        x_big, feat_idx, thresholds, left_vals, right_vals, base_score)
    assert preds_auto.shape == (300,)
    assert jnp.allclose(preds_auto, ref_big, atol=1e-5, rtol=1e-5)

    # Explicit small tile: 3 grid steps, last one partial (44 of 128 rows).
    preds_tiled = jax.block_until_ready(shap_backprop_layer_forward(
        x_big, feat_idx, thresholds, left_vals, right_vals, base_score,
        tile_rows=128))
    assert preds_tiled.shape == (300,)
    assert jnp.allclose(preds_tiled, ref_big, atol=1e-5, rtol=1e-5)

    print("KERNEL_OK")
</pallas_src>

<mosaic_0001>
module attributes {stable_mosaic.version = 11 : i64} {
  func.func @_shap_xgb_forward_kernel(%arg0: i32, %arg1: memref<8x16xf32, #tpu.memory_space<vmem>>, %arg2: memref<16x128xbf16, #tpu.memory_space<vmem>>, %arg3: memref<1x128xf32, #tpu.memory_space<vmem>>, %arg4: memref<128x3xbf16, #tpu.memory_space<vmem>>, %arg5: memref<1xf32, #tpu.memory_space<smem>>, %arg6: memref<8x1xf32, #tpu.memory_space<vmem>>) attributes {dimension_semantics = [#tpu.dimension_semantics<parallel>], iteration_bounds = array<i64: 1>, scalar_prefetch = 0 : i64, scratch_operands = 0 : i64, tpu.core_type = #tpu.core_type<tc>, window_params = [{transform_indices = @transform_0, window_bounds = array<i64: 8, 16>}, {pipeline_mode = #tpu.pipeline_mode<synchronous>, transform_indices = @transform_1, window_bounds = array<i64: 16, 128>}, {pipeline_mode = #tpu.pipeline_mode<synchronous>, transform_indices = @transform_2, window_bounds = array<i64: 1, 128>}, {pipeline_mode = #tpu.pipeline_mode<synchronous>, transform_indices = @transform_3, window_bounds = array<i64: 128, 3>}, {transform_indices = @transform_4, window_bounds = array<i64: 1>}, {transform_indices = @transform_5, window_bounds = array<i64: 8, 1>}]} {
    %c0 = arith.constant 0 : index
    %c0_0 = arith.constant 0 : index
    %0 = vector.load %arg1[%c0, %c0_0] : memref<8x16xf32, #tpu.memory_space<vmem>>, vector<8x16xf32>
    %1 = arith.truncf %0 : vector<8x16xf32> to vector<8x16xbf16>
    %2 = arith.extf %1 : vector<8x16xbf16> to vector<8x16xf32>
    %3 = arith.subf %0, %2 : vector<8x16xf32>
    %4 = arith.truncf %3 : vector<8x16xf32> to vector<8x16xbf16>
    %5 = arith.extf %4 : vector<8x16xbf16> to vector<8x16xf32>
    %6 = arith.subf %3, %5 : vector<8x16xf32>
    %7 = arith.truncf %6 : vector<8x16xf32> to vector<8x16xbf16>
    %c0_1 = arith.constant 0 : index
    %c0_2 = arith.constant 0 : index
    %8 = vector.load %arg2[%c0_1, %c0_2] : memref<16x128xbf16, #tpu.memory_space<vmem>>, vector<16x128xbf16>
    %cst = arith.constant dense<0.000000e+00> : vector<8x128xf32>
    %9 = tpu.matmul %1, %8, %cst {dimension_numbers = #tpu.dot_dimension_numbers<[1], [0], [0], [1], [0, 0, 1, 1], [], []>} : vector<8x16xbf16>, vector<16x128xbf16>, vector<8x128xf32> -> vector<8x128xf32>
    %cst_3 = arith.constant dense<0.000000e+00> : vector<8x128xf32>
    %10 = tpu.matmul %4, %8, %cst_3 {dimension_numbers = #tpu.dot_dimension_numbers<[1], [0], [0], [1], [0, 0, 1, 1], [], []>} : vector<8x16xbf16>, vector<16x128xbf16>, vector<8x128xf32> -> vector<8x128xf32>
    %11 = arith.addf %9, %10 : vector<8x128xf32>
    %cst_4 = arith.constant dense<0.000000e+00> : vector<8x128xf32>
    %12 = tpu.matmul %7, %8, %cst_4 {dimension_numbers = #tpu.dot_dimension_numbers<[1], [0], [0], [1], [0, 0, 1, 1], [], []>} : vector<8x16xbf16>, vector<16x128xbf16>, vector<8x128xf32> -> vector<8x128xf32>
    %13 = arith.addf %11, %12 : vector<8x128xf32>
    %c0_5 = arith.constant 0 : index
    %c0_6 = arith.constant 0 : index
    %14 = vector.load %arg3[%c0_5, %c0_6] : memref<1x128xf32, #tpu.memory_space<vmem>>, vector<1x128xf32>
    %15 = vector.broadcast %14 : vector<1x128xf32> to vector<8x128xf32>
    %16 = arith.cmpf olt, %13, %15 : vector<8x128xf32>
    %17 = arith.extui %16 : vector<8x128xi1> to vector<8x128xi32>
    %18 = arith.sitofp %17 : vector<8x128xi32> to vector<8x128xf32>
    %19 = arith.truncf %18 : vector<8x128xf32> to vector<8x128xbf16>
    %c0_7 = arith.constant 0 : index
    %c0_8 = arith.constant 0 : index
    %20 = vector.load %arg4[%c0_7, %c0_8] : memref<128x3xbf16, #tpu.memory_space<vmem>>, vector<128x3xbf16>
    %cst_9 = arith.constant dense<0.000000e+00> : vector<8x3xf32>
    %21 = tpu.matmul %19, %20, %cst_9 {dimension_numbers = #tpu.dot_dimension_numbers<[1], [0], [0], [1], [0, 0, 1, 1], [], []>} : vector<8x128xbf16>, vector<128x3xbf16>, vector<8x3xf32> -> vector<8x3xf32>
    %cst_10 = arith.constant dense<0.000000e+00> : vector<8xf32>
    %22 = vector.multi_reduction <add>, %21, %cst_10 [1] : vector<8x3xf32> to vector<8xf32>
    %23 = vector.shape_cast %22 : vector<8xf32> to vector<8x1xf32>
    %c0_11 = arith.constant 0 : index
    %24 = memref.load %arg5[%c0_11] : memref<1xf32, #tpu.memory_space<smem>>
    %25 = vector.broadcast %24 : f32 to vector<8x1xf32>
    %26 = arith.addf %23, %25 : vector<8x1xf32>
    %c0_12 = arith.constant 0 : index
    %c0_13 = arith.constant 0 : index
    %27 = vector.load %arg6[%c0_12, %c0_13] : memref<8x1xf32, #tpu.memory_space<vmem>>, vector<8x1xf32>
    tpu.vector_store %arg6[%c0_12, %c0_13], %26 {strides = array<i32>} : memref<8x1xf32, #tpu.memory_space<vmem>>, vector<8x1xf32>,
    return
  }
  func.func @transform_0(%arg0: i32) -> (i32, i32) {
    %c0_i32 = arith.constant 0 : i32
    %c0_i32_0 = arith.constant 0 : i32
    return %arg0, %c0_i32 : i32, i32
  }
  func.func @transform_1(%arg0: i32) -> (i32, i32) {
    %c0_i32 = arith.constant 0 : i32
    %c0_i32_0 = arith.constant 0 : i32
    %c0_i32_1 = arith.constant 0 : i32
    return %c0_i32, %c0_i32_0 : i32, i32
  }
  func.func @transform_2(%arg0: i32) -> (i32, i32) {
    %c0_i32 = arith.constant 0 : i32
    %c0_i32_0 = arith.constant 0 : i32
    %c0_i32_1 = arith.constant 0 : i32
    return %c0_i32, %c0_i32_0 : i32, i32
  }
  func.func @transform_3(%arg0: i32) -> (i32, i32) {
    %c0_i32 = arith.constant 0 : i32
    %c0_i32_0 = arith.constant 0 : i32
    %c0_i32_1 = arith.constant 0 : i32
    return %c0_i32, %c0_i32_0 : i32, i32
  }
  func.func @transform_4(%arg0: i32) -> i32 {
    %c0_i32 = arith.constant 0 : i32
    %c0_i32_0 = arith.constant 0 : i32
    return %c0_i32 : i32
  }
  func.func @transform_5(%arg0: i32) -> (i32, i32) {
    %c0_i32 = arith.constant 0 : i32
    %c0_i32_0 = arith.constant 0 : i32
    return %arg0, %c0_i32 : i32, i32
  }
}

</mosaic_0001>

<bundles_post_ra>
// kernel: tpu_custom_call.1
= control target key start
LH: loop header
LB: loop body
LE: loop exit
PB: predicated region body
PF: predicated region fallthrough
CT: control target
= control target key end

     0   :  { %v386_v0 = vmov 0.0   ;;  %vm387_vm0 = vmmov 0   ;;  %vm38_vm1 = vcmask 130048   ;;  %v388_v23 = vmov 1.0|1.0   ;;  %s465_s1 = inlined_call_operand.vmem [shape: bf16[16,128], index: 1, kind: input, shape index: {}]   ;;  %s466_s0 = inlined_call_operand.vmem [shape: f32[8,16], index: 0, kind: input, shape index: {}]   ;;  %s467_s3 = inlined_call_operand.vmem [shape: bf16[128,3], index: 3, kind: input, shape index: {}]   ;;  %s468_s2 = inlined_call_operand.vmem [shape: f32[1,128], index: 2, kind: input, shape index: {}]   ;;  %s469_s4 = inlined_call_operand.<no memory space> [shape: f32[1], index: 4, kind: input, shape index: {}]   ;;  %s470_s5 = inlined_call_operand.vmem [shape: f32[8,1], index: 5, kind: output, shape index: {}]  }
   0x1   :  { %328 = vmatprep.subr.bf16.mxu0 %v386_v0  ;;  %v377_v1 = vld [vmem:[%s465_s1] sm:$0xff]   ;;  %330 = vmatprep.mubr.msk.bf16.mxu0 %vm387_vm0, %v386_v0  ;;  %v379_v6 = vld [vmem:[%s467_s3 + $0x8] sm:$0xff]   ;;  %v380_v9 = vld [vmem:[%s467_s3 + $0x10] sm:$0xff]   ;;  %vm284_vm4 = vcmask 23552   ;;  %v289_v29 = vstv %s469_s4  ;;  %vm291_vm5 = vcmask 7168  }
   0x2   :  { %v22_v2 = vld [vmem:[%s466_s0] sm:$0xff]  ;;  %346 = vmatprep.subr.bf16.mxu1 %v386_v0  ;;  %362 = vmatprep.mubr.msk.bf16.mxu1 %vm387_vm0, %v386_v0  ;;  %v381_v10 = vld [vmem:[%s467_s3 + $0x18] sm:$0xff]   ;;  %v383_v12 = vld [vmem:[%s467_s3 + $0x28] sm:$0xff]  }
   0x3   :  { %329 = vmatpush3.bf16.msra.mxu0 %v377_v1  ;;  %v23_v3 = vpack.c.bf16 %v22_v2, %v22_v2  ;;  %v378_v4 = vld [vmem:[%s467_s3] sm:$0xff]   ;;  %v384_v14 = vld [vmem:[%s467_s3 + $0x30] sm:$0xff]   ;;  %v385_v17 = vld [vmem:[%s467_s3 + $0x38] sm:$0xff]  }
   0x4   :  { %334 = vmatprep.subr.bf16.mxu0 %v386_v0  ;;  %347 = vmatpush3.bf16.msra.mxu1 %v378_v4  ;;  %v382_v11 = vld [vmem:[%s467_s3 + $0x20] sm:$0xff]  }
   0x5   :  { %v24_v5 = vunpack.c.l.bf16 %v23_v3  ;;  %348 = vmatprep.subr.bf16.mxu1 %v386_v0  ;;  %v301_v18 = vld [vmem:[%s468_s2] ss:$0 sm:$0xff] }
   0x7   :  { %v25_v7 = vsub.f32 %v22_v2, %v24_v5 }
   0x8   :  { %349 = vmatpush3.bf16.msra.mxu1 %v379_v6 }
   0x9   :  { %v26_v8 = vpack.c.bf16 %v25_v7, %v25_v7  ;;  %350 = vmatprep.subr.bf16.mxu1 %v386_v0 }
   0xb   :  { %331 = vmatmul.mubr.msk.bf16.vlgmr.msra.gmra.mrb[0].mxu0 %vm38_vm1, %v26_v8  ;;  %v27_v13 = vunpack.c.l.bf16 %v26_v8 }
   0xc   :  { %335 = vmatpush3.bf16.msra.mxu0 %v377_v1  ;;  %336 = vmatprep.mubr.msk.bf16.mxu0 %vm387_vm0, %v386_v0 }
   0xd   :  { %340 = vmatprep.subr.bf16.mxu0 %v386_v0  ;;  %351 = vmatpush3.bf16.msra.mxu1 %v380_v9  ;;  %v28_v15 = vsub.f32 %v25_v7, %v27_v13 }
   0xe   :  { %352 = vmatprep.subr.bf16.mxu1 %v386_v0 }
   0xf   :  { %v29_v16 = vpack.c.bf16 %v28_v15, %v28_v15 }
  0x11   :  { %353 = vmatpush3.bf16.msra.mxu1 %v381_v10 }
  0x12   :  { %354 = vmatprep.subr.bf16.mxu1 %v386_v0 }
  0x15   :  { %355 = vmatpush3.bf16.msra.mxu1 %v382_v11 }
  0x16   :  { %356 = vmatprep.subr.bf16.mxu1 %v386_v0 }
  0x17   :  { %337 = vmatmul.mubr.msk.bf16.vlgmr.msra.gmra.mrb[0].mxu0 %vm38_vm1, %v23_v3 }
  0x18   :  { %341 = vmatpush3.bf16.msra.mxu0 %v377_v1  ;;  %342 = vmatprep.mubr.msk.bf16.mxu0 %vm387_vm0, %v386_v0 }
  0x19   :  { %357 = vmatpush3.bf16.msra.mxu1 %v383_v12 }
  0x1a   :  { %358 = vmatprep.subr.bf16.mxu1 %v386_v0 }
  0x1d   :  { %359 = vmatpush3.bf16.msra.mxu1 %v384_v14 }
  0x1e   :  { %360 = vmatprep.subr.bf16.mxu1 %v386_v0 }
  0x21   :  { %361 = vmatpush3.bf16.msra.mxu1 %v385_v17 }
  0x23   :  { %343 = vmatmul.mubr.msk.bf16.vlgmr.msra.gmra.mrb[0].mxu0 %vm38_vm1, %v29_v16 }
  0xf6   :  { %v162_v19 = vpop.f32.mrb[0].mxu0 }
  0xf7   :  { %vm176_vm2 = vcmp.lt.f32.partialorder %v162_v19, %v301_v18  ;;  %v344_v20 = vpop.f32.mrb[1].mxu0 }
  0xf8   :  { %vm311_vm3 = vmpackc.low %vm176_vm2, %vm176_vm2  ;;  %v165_v21 = vpop.f32.mrb[2].mxu0 }
  0xf9   :  { %v345_v22 = vpop.f32.mrb[3].mxu0  ;;  %363 = vmatmul.mubr.msk.bf16.vlgmr.msra.gmra.mrb[0].mxu1 %vm311_vm3, %v388_v23 }
 0x1cc   :  { %v278_v24 = vpop.f32.mrb[0].mxu1 }
 0x1cd   :  { %v364_v25 = vpop.f32.mrb[1].mxu1  ;;  %v285_v26 = vsel %vm284_vm4, %v278_v24, 0.0 }
 0x1ce   :  { %v281_v27 = vpop.f32.mrb[2].mxu1  ;;  %286 = vadd.xlane.f32.xlu0 %v285_v26 }
 0x1cf   :  { %v365_v28 = vpop.f32.mrb[3].mxu1 }
 0x25b   :  { %v287_v30 = vpop.xlane.xlu0 %286 }
 0x25c   :  { %v290_v31 = vadd.f32 %v289_v29, %v287_v30 }
 0x25e   :  { %292 = vst.msk [vmem:[%s470_s5] sm:$0xff] %vm291_vm5, %v290_v31 }

</bundles_post_ra>
